<compile_context>
chip_gen: v7x
topology: tpu7x:2x2x1
jax: 0.10.0
libtpu: 0.0.40
codegen_flags: <defaults>
</compile_context>

<pallas_src>
import functools
import math

import jax
import jax.numpy as jnp
from jax.experimental import pallas as pl
from jax.experimental.pallas import tpu as pltpu

MOVEMENT_NUM = 6
NUM_CLS = MOVEMENT_NUM + 1      # 7 class logits
CLS_PAD = 128                   # class slice padded to a full lane tile inside fused W1
LOGIT_W = 8                     # logits half of the output slab (col 7 is exact zero)
COORD_W = 8                     # coord half: [range | ang,ang | bnd,bnd,bnd | 0,0]
OUT_W = LOGIT_W + COORD_W       # single fused [tm, 16] output slab


# --------------------------------------------------------------------------------------
# Kernel
# --------------------------------------------------------------------------------------
def _detr_heads_kernel(x_ref, w1_ref, b1_ref, w2_ref, b2_ref, w3_ref, cst_ref, out_ref):
    """One row tile: [tm, D] tokens -> fused [tm, 16] slab (logits | coords).

    w1_ref : [D, CLS_PAD + 3H] fused (class | range-L1 | angle-L1 | boundary-L1), bf16
    b1_ref : [1, CLS_PAD + 3H] packed f32 bias for the fused first layer
    w2_ref : [3, H, H]         per-head second layers, bf16
    b2_ref : [3, 1, H]         packed f32 biases
    w3_ref : [3, H, 8]         per-head third layers (each head owns its coord cols), bf16
    cst_ref: [3, 8]            row0 = packed b3, row1 = sigmoid scale, row2 = offset
    """
    x = x_ref[...]                                   # [tm, D] bf16
    H = w2_ref.shape[-1]

    # ---- fused first layer: one lane-dense MXU matmul serves all four heads ----
    z = jnp.dot(x, w1_ref[...], preferred_element_type=jnp.float32) + b1_ref[...]

    # ---- per-head layer 2 + layer 3, accumulated straight into the [tm, 8] coord slab
    # (no [tm, 3H] concat copy, no block-diagonal zero FLOPs) ----
    raw = cst_ref[0:1, :]                            # packed b3, broadcast over rows
    for k in range(3):
        h1 = jnp.maximum(z[:, CLS_PAD + k * H: CLS_PAD + (k + 1) * H], 0.0)
        h2 = jnp.dot(h1.astype(x.dtype), w2_ref[k],
                     preferred_element_type=jnp.float32) + b2_ref[k]
        h2 = jnp.maximum(h2, 0.0).astype(x.dtype)
        raw = raw + jnp.dot(h2, w3_ref[k], preferred_element_type=jnp.float32)

    # sigmoid via EUP exp + approx reciprocal; the scale/offset epilogue implements
    # sigmoid*12 | (sigmoid-0.5)*pi | sigmoid*1.5 per column.
    sig = pl.reciprocal(1.0 + jnp.exp(-raw), approx=True)
    coord = sig * cst_ref[1:2, :] + cst_ref[2:3, :]

    # single fused output store: cols 0:8 = class-logit slab, cols 8:16 = coord slab
    out_ref[...] = jnp.concatenate([z[:, :LOGIT_W], coord], axis=-1)


# --------------------------------------------------------------------------------------
# One-time weight packing (call once at init; NOT on the per-forward path)
# --------------------------------------------------------------------------------------
def pack_head_params(params):
    """Fuse the ~20 head tensors into 6 lane-dense operands (bf16 weights, f32 biases)."""
    wc, bc = params["wc"], params["bc"]
    rw1, rb1, rw2, rb2, rw3, rb3 = params["range"]
    aw1, ab1, aw2, ab2, aw3, ab3 = params["angle"]
    bw1, bb1, bw2, bb2, bw3, bb3 = params["boundary"]
    _, H = rw1.shape
    bf16 = jnp.bfloat16

    wc_pad = jnp.pad(wc, ((0, 0), (0, CLS_PAD - wc.shape[1])))
    bc_pad = jnp.pad(bc, ((0, 0), (0, CLS_PAD - bc.shape[1])))
    w1_cat = jnp.concatenate([wc_pad, rw1, aw1, bw1], axis=1).astype(bf16)   # [D, 128+3H]
    b1_cat = jnp.concatenate([bc_pad, rb1, ab1, bb1], axis=1).astype(jnp.float32)

    w2_cat = jnp.stack([rw2, aw2, bw2], axis=0).astype(bf16)                 # [3, H, H]
    b2_cat = jnp.stack([rb2, ab2, bb2], axis=0).astype(jnp.float32)          # [3, 1, H]

    # per-head third layer packed [3, H, 8]: head 0 -> col 0 (range), head 1 -> cols 1:3
    # (angle), head 2 -> cols 3:6 (boundary); cols 6:8 are zero padding.
    w3_cat = jnp.zeros((3, H, COORD_W), jnp.float32)
    w3_cat = w3_cat.at[0, :, 0:1].set(rw3)
    w3_cat = w3_cat.at[1, :, 1:3].set(aw3)
    w3_cat = w3_cat.at[2, :, 3:6].set(bw3)
    w3_cat = w3_cat.astype(bf16)
    # TODO(synk): on v7x, w2_cat could optionally be stored fp8 (native MXU path) if the
    # accuracy budget tolerates it; kept bf16 here.

    b3_cat = jnp.concatenate(
        [rb3, ab3, bb3, jnp.zeros((1, COORD_W - 6), jnp.float32)], axis=1)
    scale = jnp.array([[12.0, math.pi, math.pi, 1.5, 1.5, 1.5, 0.0, 0.0]], jnp.float32)
    offset = jnp.array([[0.0, -0.5 * math.pi, -0.5 * math.pi, 0.0, 0.0, 0.0, 0.0, 0.0]],
                       jnp.float32)
    cst = jnp.concatenate([b3_cat, scale, offset], axis=0)                   # [3, 8]
    return (w1_cat, b1_cat, w2_cat, b2_cat, w3_cat, cst)


# --------------------------------------------------------------------------------------
# One-time (cached) capability check for single-buffered resident weights
# --------------------------------------------------------------------------------------
@functools.lru_cache(maxsize=None)
def _buffered_weights_supported():
    """Lower+compile a tiny representative kernel once; no per-forward probe or sync."""
    try:
        def _probe(x_ref, w_ref, o_ref):
            o_ref[...] = x_ref[...] + w_ref[0]

        fn = pl.pallas_call(
            _probe,
            out_shape=jax.ShapeDtypeStruct((16, 128), jnp.float32),
            grid=(2,),
            in_specs=[
                pl.BlockSpec((8, 128), lambda i: (i, 0)),
                pl.BlockSpec((3, 8, 128), lambda i: (0, 0, 0),
                             pipeline_mode=pl.Buffered(1)),
            ],
            out_specs=pl.BlockSpec((8, 128), lambda i: (i, 0)),
        )
        jax.jit(fn).lower(
            jax.ShapeDtypeStruct((16, 128), jnp.float32),
            jax.ShapeDtypeStruct((3, 8, 128), jnp.float32),
        ).compile()
        return True
    except Exception:
        return False


def _resident_spec(arr, single_buffered):
    nd = arr.ndim
    index_map = lambda i, _nd=nd: (0,) * _nd   # constant block index -> fetched once, resident
    if single_buffered:
        # weights never change across the row grid -> one buffer, half the VMEM footprint
        return pl.BlockSpec(arr.shape, index_map, pipeline_mode=pl.Buffered(1))
    return pl.BlockSpec(arr.shape, index_map)


def _vmem_limit_bytes(tm, d, h, weight_nbuf):
    """Right-sized VMEM limit: footprint + 25% margin, clamped to [32 MiB, 96 MiB]."""
    w = (d * (CLS_PAD + 3 * h) + 3 * h * h + 3 * h * COORD_W) * 2            # bf16 weights
    b = ((CLS_PAD + 3 * h) + 3 * h + 3 * COORD_W) * 4                        # f32 biases/consts
    io = 2 * tm * d * 2 + 2 * tm * OUT_W * 4                                 # double-buffered I/O
    inter = tm * (CLS_PAD + 3 * h) * 4 + tm * 3 * h * 8                      # z(f32) + h1/h2 temps
    total = int(1.25 * (weight_nbuf * (w + b) + io + inter))
    return max(32 * 1024 * 1024, min(total, 96 * 1024 * 1024))


# --------------------------------------------------------------------------------------
# pallas_call wrapper (kernel-only per call; weights are pre-packed)
# --------------------------------------------------------------------------------------
def detr_heads_pallas(hs, packed_weights, *, tm=512):
    """hs: [L, B, Q, D] -> (outputs_class [L,B,Q,7], outputs_coord [L,B,Q,6]).

    packed_weights: output of pack_head_params (pack ONCE at init).
    tm: rows (tokens) per grid step. 512 fits v7x's 64 MiB VMEM with single-buffered
    weights; 512-1024 is fine on v5e/v6e's 128 MiB.
    """
    L, B, Q, D = hs.shape
    N = L * B * Q
    H = packed_weights[2].shape[-1]
    x = hs.reshape(N, D).astype(jnp.bfloat16)        # bf16 activations; f32 MXU accumulation

    # row tile: multiple of 8, no larger than the (8-rounded) token count
    tm = max(8, min(int(tm), pl.cdiv(N, 8) * 8) // 8 * 8)
    grid = (pl.cdiv(N, tm),)   # partial last block handled by Pallas masking; no jnp.pad pass

    single_buffered = _buffered_weights_supported()
    in_specs = [pl.BlockSpec((tm, D), lambda i: (i, 0))]
    in_specs += [_resident_spec(w, single_buffered) for w in packed_weights]

    out = pl.pallas_call(
        _detr_heads_kernel,
        out_shape=jax.ShapeDtypeStruct((N, OUT_W), jnp.float32),
        grid=grid,
        in_specs=in_specs,
        out_specs=pl.BlockSpec((tm, OUT_W), lambda i: (i, 0)),
        compiler_params=pltpu.CompilerParams(
            # row tiles are independent -> shard across TensorCores (v7x megacore)
            dimension_semantics=("parallel",),
            vmem_limit_bytes=_vmem_limit_bytes(tm, D, H, 1 if single_buffered else 2),
        ),
    )(x, *packed_weights)

    outputs_class = out[:, :NUM_CLS].reshape(L, B, Q, NUM_CLS)
    outputs_coord = out[:, LOGIT_W:LOGIT_W + 6].reshape(L, B, Q, 6)
    return outputs_class, outputs_coord


# --------------------------------------------------------------------------------------
# Pure-JAX references (bf16=True mirrors the kernel's casts; bf16=False is full f32)
# --------------------------------------------------------------------------------------
def detr_heads_reference(hs, params, *, bf16=False):
    cast = (lambda a: a.astype(jnp.bfloat16)) if bf16 else (lambda a: a)

    def lin(x, w, b):
        return jnp.dot(cast(x), cast(w), preferred_element_type=jnp.float32) + b

    def mlp3(x, w1, b1, w2, b2, w3, b3):
        h = jnp.maximum(lin(x, w1, b1), 0.0)
        h = jnp.maximum(lin(h, w2, b2), 0.0)
        return lin(h, w3, b3)

    logits = lin(hs, params["wc"], params["bc"])
    rng = jax.nn.sigmoid(mlp3(hs, *params["range"])) * 12.0
    ang = (jax.nn.sigmoid(mlp3(hs, *params["angle"])) - 0.5) * math.pi
    bnd = jax.nn.sigmoid(mlp3(hs, *params["boundary"])) * 1.5
    return logits, jnp.concatenate([rng, ang, bnd], axis=-1)


# --------------------------------------------------------------------------------------
# Synthetic model pieces (deterministic, plain JAX)
# --------------------------------------------------------------------------------------
def init_params(key, hidden_dim, num_queries):
    """Deterministic synthetic weights matching DETR.__init__ shapes ([in, out] layout)."""
    def linear(k, n_in, n_out):
        kw, kb = jax.random.split(k)
        scale = 1.0 / math.sqrt(n_in)
        w = jax.random.uniform(kw, (n_in, n_out), jnp.float32, -scale, scale)
        b = jax.random.uniform(kb, (1, n_out), jnp.float32, -scale, scale)
        return w, b

    def mlp(k, n_in, n_hidden, n_out):
        k1, k2, k3 = jax.random.split(k, 3)
        w1, b1 = linear(k1, n_in, n_hidden)
        w2, b2 = linear(k2, n_hidden, n_hidden)
        w3, b3 = linear(k3, n_hidden, n_out)
        return (w1, b1, w2, b2, w3, b3)

    kc, kr, ka, kb_, kq = jax.random.split(key, 5)
    wc, bc = linear(kc, hidden_dim, NUM_CLS)
    return {
        "wc": wc, "bc": bc,
        "range": mlp(kr, hidden_dim, hidden_dim * 4, 1),
        "angle": mlp(ka, hidden_dim, hidden_dim * 4, 2),
        "boundary": mlp(kb_, hidden_dim, hidden_dim * 4, 3),
        "query_embed": jax.random.normal(kq, (num_queries, hidden_dim), jnp.float32),
    }


def synthetic_backbone_transformer(samples, query_embed, proj, layer_bias):
    # TODO(synk): `backbone` and `transformer` are external modules passed to
    # DETR.__init__ (not defined in the reference file); replaced by a deterministic
    # plain-JAX stand-in producing `hs` of shape [L, B, Q, D].
    feat = jnp.mean(samples, axis=(2, 3))                 # [B, C] global-avg-pool "backbone"
    feat = jnp.tanh(feat @ proj)                          # [B, D]
    hs = jnp.tanh(
        feat[None, :, None, :]
        + query_embed[None, None, :, :]
        + layer_bias[:, None, None, :]
    )
    return hs                                             # [L, B, Q, D]


def detr_forward(samples, params, packed_heads, proj, layer_bias, *, tm=512):
    hs = synthetic_backbone_transformer(samples, params["query_embed"], proj, layer_bias)
    outputs_class, outputs_coord = detr_heads_pallas(hs, packed_heads, tm=tm)
    # aux_loss=False, add_obliquity=False (defaults)
    return {"pred_logits": outputs_class[-1], "pred_coords": outputs_coord[-1]}, hs


# --------------------------------------------------------------------------------------
if __name__ == "__main__":
    key = jax.random.PRNGKey(0)
    k_param, k_img, k_proj, k_lb = jax.random.split(key, 4)

    B, C, Himg, Wimg = 2, 3, 16, 16
    hidden_dim = 32            # MLP hidden = 4*32 = 128 -> lane-aligned fused slices
    num_queries = 10           # (do not deploy with D < 128; real DETR uses D=256)
    num_dec_layers = 2         # N = L*B*Q = 40 tokens

    params = init_params(k_param, hidden_dim, num_queries)
    packed_heads = pack_head_params(params)               # one-time packing at init
    jax.block_until_ready(packed_heads)

    samples = jax.random.normal(k_img, (B, C, Himg, Wimg), jnp.float32)      # NCHW images
    proj = jax.random.normal(k_proj, (C, hidden_dim), jnp.float32) * 0.1
    layer_bias = jax.random.normal(k_lb, (num_dec_layers, hidden_dim), jnp.float32) * 0.1

    # tm=16 -> grid=(3,) with a partial last block: exercises the row pipeline and the
    # pad-free tail handling.
    out, hs = detr_forward(samples, params, packed_heads, proj, layer_bias, tm=16)
    jax.block_until_ready(out)

    # correctness: tight check vs a reference mirroring the kernel's bf16 casts (coords
    # slightly looser to budget the approx-reciprocal sigmoid); loose check vs pure f32.
    ref16_logits, ref16_coords = detr_heads_reference(hs, params, bf16=True)
    ref32_logits, ref32_coords = detr_heads_reference(hs, params, bf16=False)

    assert out["pred_logits"].shape == (B, num_queries, NUM_CLS)
    assert out["pred_coords"].shape == (B, num_queries, 6)
    assert jnp.allclose(out["pred_logits"], ref16_logits[-1], atol=1e-2, rtol=1e-2)
    assert jnp.allclose(out["pred_coords"], ref16_coords[-1], atol=2e-2, rtol=2e-2)
    assert jnp.allclose(out["pred_logits"], ref32_logits[-1], atol=5e-2, rtol=5e-2)
    assert jnp.allclose(out["pred_coords"], ref32_coords[-1], atol=5e-2, rtol=5e-2)

    print("KERNEL_OK")
</pallas_src>

<mosaic_0001>
module attributes {stable_mosaic.version = 11 : i64} {
  func.func @_detr_heads_kernel(%arg0: i32, %arg1: memref<16x32xbf16, #tpu.memory_space<vmem>>, %arg2: memref<32x512xbf16, #tpu.memory_space<vmem>>, %arg3: memref<1x512xf32, #tpu.memory_space<vmem>>, %arg4: memref<3x128x128xbf16, #tpu.memory_space<vmem>>, %arg5: memref<3x1x128xf32, #tpu.memory_space<vmem>>, %arg6: memref<3x128x8xbf16, #tpu.memory_space<vmem>>, %arg7: memref<3x8xf32, #tpu.memory_space<vmem>>, %arg8: memref<16x16xf32, #tpu.memory_space<vmem>>) attributes {dimension_semantics = [#tpu.dimension_semantics<parallel>], iteration_bounds = array<i64: 3>, scalar_prefetch = 0 : i64, scratch_operands = 0 : i64, tpu.core_type = #tpu.core_type<tc>, window_params = [{transform_indices = @transform_0, window_bounds = array<i64: 16, 32>}, {pipeline_mode = #tpu.pipeline_mode<synchronous>, transform_indices = @transform_1, window_bounds = array<i64: 32, 512>}, {pipeline_mode = #tpu.pipeline_mode<synchronous>, transform_indices = @transform_2, window_bounds = array<i64: 1, 512>}, {pipeline_mode = #tpu.pipeline_mode<synchronous>, transform_indices = @transform_3, window_bounds = array<i64: 3, 128, 128>}, {pipeline_mode = #tpu.pipeline_mode<synchronous>, transform_indices = @transform_4, window_bounds = array<i64: 3, 1, 128>}, {pipeline_mode = #tpu.pipeline_mode<synchronous>, transform_indices = @transform_5, window_bounds = array<i64: 3, 128, 8>}, {pipeline_mode = #tpu.pipeline_mode<synchronous>, transform_indices = @transform_6, window_bounds = array<i64: 3, 8>}, {transform_indices = @transform_7, window_bounds = array<i64: 16, 16>}]} {
    %c0 = arith.constant 0 : index
    %c0_0 = arith.constant 0 : index
    %0 = vector.load %arg1[%c0, %c0_0] : memref<16x32xbf16, #tpu.memory_space<vmem>>, vector<16x32xbf16>
    %c0_1 = arith.constant 0 : index
    %c0_2 = arith.constant 0 : index
    %1 = vector.load %arg2[%c0_1, %c0_2] : memref<32x512xbf16, #tpu.memory_space<vmem>>, vector<32x512xbf16>
    %cst = arith.constant dense<0.000000e+00> : vector<16x512xf32>
    %2 = tpu.matmul %0, %1, %cst {dimension_numbers = #tpu.dot_dimension_numbers<[1], [0], [0], [1], [0, 0, 1, 1], [], []>} : vector<16x32xbf16>, vector<32x512xbf16>, vector<16x512xf32> -> vector<16x512xf32>
    %c0_3 = arith.constant 0 : index
    %c0_4 = arith.constant 0 : index
    %3 = vector.load %arg3[%c0_3, %c0_4] : memref<1x512xf32, #tpu.memory_space<vmem>>, vector<1x512xf32>
    %4 = vector.broadcast %3 : vector<1x512xf32> to vector<16x512xf32>
    %5 = arith.addf %2, %4 : vector<16x512xf32>
    %c0_5 = arith.constant 0 : index
    %c0_6 = arith.constant 0 : index
    %6 = vector.load %arg7[%c0_5, %c0_6] : memref<3x8xf32, #tpu.memory_space<vmem>>, vector<1x8xf32>
    %7 = vector.extract_strided_slice %5 {offsets = [0, 128], sizes = [16, 128], strides = [1, 1]} : vector<16x512xf32> to vector<16x128xf32>
    %cst_7 = arith.constant 0.000000e+00 : f32
    %8 = vector.broadcast %cst_7 : f32 to vector<16x128xf32>
    %9 = arith.maximumf %7, %8 : vector<16x128xf32>
    %10 = arith.truncf %9 : vector<16x128xf32> to vector<16x128xbf16>
    %c0_8 = arith.constant 0 : index
    %c0_9 = arith.constant 0 : index
    %c0_10 = arith.constant 0 : index
    %11 = vector.load %arg4[%c0_8, %c0_9, %c0_10] : memref<3x128x128xbf16, #tpu.memory_space<vmem>>, vector<1x128x128xbf16>
    %12 = vector.shape_cast %11 : vector<1x128x128xbf16> to vector<128x128xbf16>
    %cst_11 = arith.constant dense<0.000000e+00> : vector<16x128xf32>
    %13 = tpu.matmul %10, %12, %cst_11 {dimension_numbers = #tpu.dot_dimension_numbers<[1], [0], [0], [1], [0, 0, 1, 1], [], []>} : vector<16x128xbf16>, vector<128x128xbf16>, vector<16x128xf32> -> vector<16x128xf32>
    %c0_12 = arith.constant 0 : index
    %c0_13 = arith.constant 0 : index
    %c0_14 = arith.constant 0 : index
    %14 = vector.load %arg5[%c0_12, %c0_13, %c0_14] : memref<3x1x128xf32, #tpu.memory_space<vmem>>, vector<1x1x128xf32>
    %15 = vector.shape_cast %14 : vector<1x1x128xf32> to vector<1x128xf32>
    %16 = vector.broadcast %15 : vector<1x128xf32> to vector<16x128xf32>
    %17 = arith.addf %13, %16 : vector<16x128xf32>
    %cst_15 = arith.constant 0.000000e+00 : f32
    %18 = vector.broadcast %cst_15 : f32 to vector<16x128xf32>
    %19 = arith.maximumf %17, %18 : vector<16x128xf32>
    %20 = arith.truncf %19 : vector<16x128xf32> to vector<16x128xbf16>
    %c0_16 = arith.constant 0 : index
    %c0_17 = arith.constant 0 : index
    %c0_18 = arith.constant 0 : index
    %21 = vector.load %arg6[%c0_16, %c0_17, %c0_18] : memref<3x128x8xbf16, #tpu.memory_space<vmem>>, vector<1x128x8xbf16>
    %22 = vector.shape_cast %21 : vector<1x128x8xbf16> to vector<128x8xbf16>
    %cst_19 = arith.constant dense<0.000000e+00> : vector<16x8xf32>
    %23 = tpu.matmul %20, %22, %cst_19 {dimension_numbers = #tpu.dot_dimension_numbers<[1], [0], [0], [1], [0, 0, 1, 1], [], []>} : vector<16x128xbf16>, vector<128x8xbf16>, vector<16x8xf32> -> vector<16x8xf32>
    %24 = vector.broadcast %6 : vector<1x8xf32> to vector<16x8xf32>
    %25 = arith.addf %24, %23 : vector<16x8xf32>
    %26 = vector.extract_strided_slice %5 {offsets = [0, 256], sizes = [16, 128], strides = [1, 1]} : vector<16x512xf32> to vector<16x128xf32>
    %cst_20 = arith.constant 0.000000e+00 : f32
    %27 = vector.broadcast %cst_20 : f32 to vector<16x128xf32>
    %28 = arith.maximumf %26, %27 : vector<16x128xf32>
    %29 = arith.truncf %28 : vector<16x128xf32> to vector<16x128xbf16>
    %c1 = arith.constant 1 : index
    %c0_21 = arith.constant 0 : index
    %c0_22 = arith.constant 0 : index
    %30 = vector.load %arg4[%c1, %c0_21, %c0_22] : memref<3x128x128xbf16, #tpu.memory_space<vmem>>, vector<1x128x128xbf16>
    %31 = vector.shape_cast %30 : vector<1x128x128xbf16> to vector<128x128xbf16>
    %cst_23 = arith.constant dense<0.000000e+00> : vector<16x128xf32>
    %32 = tpu.matmul %29, %31, %cst_23 {dimension_numbers = #tpu.dot_dimension_numbers<[1], [0], [0], [1], [0, 0, 1, 1], [], []>} : vector<16x128xbf16>, vector<128x128xbf16>, vector<16x128xf32> -> vector<16x128xf32>
    %c1_24 = arith.constant 1 : index
    %c0_25 = arith.constant 0 : index
    %c0_26 = arith.constant 0 : index
    %33 = vector.load %arg5[%c1_24, %c0_25, %c0_26] : memref<3x1x128xf32, #tpu.memory_space<vmem>>, vector<1x1x128xf32>
    %34 = vector.shape_cast %33 : vector<1x1x128xf32> to vector<1x128xf32>
    %35 = vector.broadcast %34 : vector<1x128xf32> to vector<16x128xf32>
    %36 = arith.addf %32, %35 : vector<16x128xf32>
    %cst_27 = arith.constant 0.000000e+00 : f32
    %37 = vector.broadcast %cst_27 : f32 to vector<16x128xf32>
    %38 = arith.maximumf %36, %37 : vector<16x128xf32>
    %39 = arith.truncf %38 : vector<16x128xf32> to vector<16x128xbf16>
    %c1_28 = arith.constant 1 : index
    %c0_29 = arith.constant 0 : index
    %c0_30 = arith.constant 0 : index
    %40 = vector.load %arg6[%c1_28, %c0_29, %c0_30] : memref<3x128x8xbf16, #tpu.memory_space<vmem>>, vector<1x128x8xbf16>
    %41 = vector.shape_cast %40 : vector<1x128x8xbf16> to vector<128x8xbf16>
    %cst_31 = arith.constant dense<0.000000e+00> : vector<16x8xf32>
    %42 = tpu.matmul %39, %41, %cst_31 {dimension_numbers = #tpu.dot_dimension_numbers<[1], [0], [0], [1], [0, 0, 1, 1], [], []>} : vector<16x128xbf16>, vector<128x8xbf16>, vector<16x8xf32> -> vector<16x8xf32>
    %43 = arith.addf %25, %42 : vector<16x8xf32>
    %44 = vector.extract_strided_slice %5 {offsets = [0, 384], sizes = [16, 128], strides = [1, 1]} : vector<16x512xf32> to vector<16x128xf32>
    %cst_32 = arith.constant 0.000000e+00 : f32
    %45 = vector.broadcast %cst_32 : f32 to vector<16x128xf32>
    %46 = arith.maximumf %44, %45 : vector<16x128xf32>
    %47 = arith.truncf %46 : vector<16x128xf32> to vector<16x128xbf16>
    %c2 = arith.constant 2 : index
    %c0_33 = arith.constant 0 : index
    %c0_34 = arith.constant 0 : index
    %48 = vector.load %arg4[%c2, %c0_33, %c0_34] : memref<3x128x128xbf16, #tpu.memory_space<vmem>>, vector<1x128x128xbf16>
    %49 = vector.shape_cast %48 : vector<1x128x128xbf16> to vector<128x128xbf16>
    %cst_35 = arith.constant dense<0.000000e+00> : vector<16x128xf32>
    %50 = tpu.matmul %47, %49, %cst_35 {dimension_numbers = #tpu.dot_dimension_numbers<[1], [0], [0], [1], [0, 0, 1, 1], [], []>} : vector<16x128xbf16>, vector<128x128xbf16>, vector<16x128xf32> -> vector<16x128xf32>
    %c2_36 = arith.constant 2 : index
    %c0_37 = arith.constant 0 : index
    %c0_38 = arith.constant 0 : index
    %51 = vector.load %arg5[%c2_36, %c0_37, %c0_38] : memref<3x1x128xf32, #tpu.memory_space<vmem>>, vector<1x1x128xf32>
    %52 = vector.shape_cast %51 : vector<1x1x128xf32> to vector<1x128xf32>
    %53 = vector.broadcast %52 : vector<1x128xf32> to vector<16x128xf32>
    %54 = arith.addf %50, %53 : vector<16x128xf32>
    %cst_39 = arith.constant 0.000000e+00 : f32
    %55 = vector.broadcast %cst_39 : f32 to vector<16x128xf32>
    %56 = arith.maximumf %54, %55 : vector<16x128xf32>
    %57 = arith.truncf %56 : vector<16x128xf32> to vector<16x128xbf16>
    %c2_40 = arith.constant 2 : index
    %c0_41 = arith.constant 0 : index
    %c0_42 = arith.constant 0 : index
    %58 = vector.load %arg6[%c2_40, %c0_41, %c0_42] : memref<3x128x8xbf16, #tpu.memory_space<vmem>>, vector<1x128x8xbf16>
    %59 = vector.shape_cast %58 : vector<1x128x8xbf16> to vector<128x8xbf16>
    %cst_43 = arith.constant dense<0.000000e+00> : vector<16x8xf32>
    %60 = tpu.matmul %57, %59, %cst_43 {dimension_numbers = #tpu.dot_dimension_numbers<[1], [0], [0], [1], [0, 0, 1, 1], [], []>} : vector<16x128xbf16>, vector<128x8xbf16>, vector<16x8xf32> -> vector<16x8xf32>
    %61 = arith.addf %43, %60 : vector<16x8xf32>
    %cst_44 = arith.constant 0.000000e+00 : f32
    %62 = vector.broadcast %cst_44 : f32 to vector<16x8xf32>
    %63 = arith.subf %62, %61 : vector<16x8xf32>
    %64 = math.exp %63 : vector<16x8xf32>
    %cst_45 = arith.constant 1.000000e+00 : f32
    %65 = vector.broadcast %cst_45 : f32 to vector<16x8xf32>
    %66 = arith.addf %65, %64 : vector<16x8xf32>
    %67 = tpu.reciprocal %66 {approx = true} : vector<16x8xf32> -> vector<16x8xf32>
    %c1_46 = arith.constant 1 : index
    %c0_47 = arith.constant 0 : index
    %68 = vector.load %arg7[%c1_46, %c0_47] : memref<3x8xf32, #tpu.memory_space<vmem>>, vector<1x8xf32>
    %69 = vector.broadcast %68 : vector<1x8xf32> to vector<16x8xf32>
    %70 = arith.mulf %67, %69 : vector<16x8xf32>
    %c2_48 = arith.constant 2 : index
    %c0_49 = arith.constant 0 : index
    %71 = vector.load %arg7[%c2_48, %c0_49] : memref<3x8xf32, #tpu.memory_space<vmem>>, vector<1x8xf32>
    %72 = vector.broadcast %71 : vector<1x8xf32> to vector<16x8xf32>
    %73 = arith.addf %70, %72 : vector<16x8xf32>
    %74 = vector.extract_strided_slice %5 {offsets = [0, 0], sizes = [16, 8], strides = [1, 1]} : vector<16x512xf32> to vector<16x8xf32>
    %75 = tpu.concatenate %74, %73 in 1 : vector<16x8xf32>, vector<16x8xf32> -> vector<16x16xf32>
    %c0_50 = arith.constant 0 : index
    %c0_51 = arith.constant 0 : index
    %76 = vector.load %arg8[%c0_50, %c0_51] : memref<16x16xf32, #tpu.memory_space<vmem>>, vector<16x16xf32>
    tpu.vector_store %arg8[%c0_50, %c0_51], %75 {strides = array<i32>} : memref<16x16xf32, #tpu.memory_space<vmem>>, vector<16x16xf32>,
    return
  }
  func.func @transform_0(%arg0: i32) -> (i32, i32) {
    %c0_i32 = arith.constant 0 : i32
    %c0_i32_0 = arith.constant 0 : i32
    return %arg0, %c0_i32 : i32, i32
  }
  func.func @transform_1(%arg0: i32) -> (i32, i32) {
    %c0_i32 = arith.constant 0 : i32
    %c0_i32_0 = arith.constant 0 : i32
    %c0_i32_1 = arith.constant 0 : i32
    return %c0_i32, %c0_i32_0 : i32, i32
  }
  func.func @transform_2(%arg0: i32) -> (i32, i32) {
    %c0_i32 = arith.constant 0 : i32
    %c0_i32_0 = arith.constant 0 : i32
    %c0_i32_1 = arith.constant 0 : i32
    return %c0_i32, %c0_i32_0 : i32, i32
  }
  func.func @transform_3(%arg0: i32) -> (i32, i32, i32) {
    %c0_i32 = arith.constant 0 : i32
    %c0_i32_0 = arith.constant 0 : i32
    %c0_i32_1 = arith.constant 0 : i32
    %c0_i32_2 = arith.constant 0 : i32
    return %c0_i32, %c0_i32_0, %c0_i32_1 : i32, i32, i32
  }
  func.func @transform_4(%arg0: i32) -> (i32, i32, i32) {
    %c0_i32 = arith.constant 0 : i32
    %c0_i32_0 = arith.constant 0 : i32
    %c0_i32_1 = arith.constant 0 : i32
    %c0_i32_2 = arith.constant 0 : i32
    return %c0_i32, %c0_i32_0, %c0_i32_1 : i32, i32, i32
  }
  func.func @transform_5(%arg0: i32) -> (i32, i32, i32) {
    %c0_i32 = arith.constant 0 : i32
    %c0_i32_0 = arith.constant 0 : i32
    %c0_i32_1 = arith.constant 0 : i32
    %c0_i32_2 = arith.constant 0 : i32
    return %c0_i32, %c0_i32_0, %c0_i32_1 : i32, i32, i32
  }
  func.func @transform_6(%arg0: i32) -> (i32, i32) {
    %c0_i32 = arith.constant 0 : i32
    %c0_i32_0 = arith.constant 0 : i32
    %c0_i32_1 = arith.constant 0 : i32
    return %c0_i32, %c0_i32_0 : i32, i32
  }
  func.func @transform_7(%arg0: i32) -> (i32, i32) {
    %c0_i32 = arith.constant 0 : i32
    %c0_i32_0 = arith.constant 0 : i32
    return %arg0, %c0_i32 : i32, i32
  }
}

</mosaic_0001>

<bundles_post_ra>
// kernel: tpu_custom_call.1
= control target key start
LH: loop header
LB: loop body
LE: loop exit
PB: predicated region body
PF: predicated region fallthrough
CT: control target
= control target key end

     0   :  { %12 = vsyncpa [#allocation3], 0  ;;  %s2123_s24 = smov 0   ;;  %s2125_s25 = smov 0   ;;  %s2484_s0 = inlined_call_operand.vmem [shape: bf16[40,32], index: 0, kind: input, shape index: {}]   ;;  %s2485_s1 = inlined_call_operand.hbm [shape: bf16[32,512], index: 1, kind: input, shape index: {}]   ;;  %s2486_s2 = inlined_call_operand.vmem [shape: f32[1,512], index: 2, kind: input, shape index: {}]   ;;  %s2487_s3 = inlined_call_operand.vmem [shape: bf16[3,128,128], index: 3, kind: input, shape index: {}]   ;;  %s2488_s4 = inlined_call_operand.vmem [shape: f32[3,1,128], index: 4, kind: input, shape index: {}]   ;;  %s2489_s5 = inlined_call_operand.vmem [shape: bf16[3,128,8], index: 5, kind: input, shape index: {}]   ;;  %s2490_s6 = inlined_call_operand.vmem [shape: f32[3,8], index: 6, kind: input, shape index: {}]   ;;  %s2491_s7 = inlined_call_operand.vmem [shape: f32[40,16], index: 7, kind: output, shape index: {}]  }
   0x1   :  { %s2127_s26 = smov 0  }
   0x2 LB: > { %s2136_s27 = sadd.s32 4294967295, %s2042_s26   ;;  %s2138_s28 = sadd.s32 1, %s2042_s26   ;;  %s2042_s26 = sphi %s2127_s26, %s2503_s26   ;;  %s2038_s25 = sphi %s2125_s25, %s2502_s25   ;;  %s2034_s24 = sphi %s2123_s24, %s2501_s24  }
   0x3   : > { %s174_s29 = ssub.s32 %s2042_s26, %s2138_s28  ;;  %s177_s30 = sadd.s32 1, %s2038_s25 }
   0x4   : > { %p175_p0 = scmp.eq.s32.totalorder %s174_s29, 0  ;;  %p187_p1 = scmp.ne.s32.totalorder %s2038_s25, %s2034_s24 }
   0x5   : > { %p188_p2 = scmp.eq.s32.totalorder %s2136_s27, 2  ;;  %p1439_p3 = scmp.ge.s32.totalorder %s2042_s26, 1 }
   0x6   : > { %s2146_s8 = scalar_select %p175_p0, %s2038_s25, %s177_s30  }
   0x7   : > { %p2148_p4 = por %p188_p2, %p187_p1  ;;  %p201_p5 = scmp.lt.s32.totalorder %s2042_s26, 4 }
   0x8   : > { %p2492_p6 = scmp.eq.s32.totalorder %s2136_s27, 0  ;;  %s2076_s11 = smov [#allocation2]  }
   0x9   : > { %s2494_s9 = scalar_select %p2148_p4, 1, 0 }
   0xa   : > { %p2153_p7 = pnand %p1439_p3, %p201_p5  ;;  %s213_s12 = sshll.u32 %s2076_s11, 4  ;;  %s214_s12 = int_to_ptr.vmem [resolvable:$true] %s213_s12 }
   0xb   : > { %s1956_s16 = scalar_lea.hbm %s2485_s1, 1024 }
   0xc   : > { %s2495_s10 = scalar_select %p2153_p7, 1, 0 }
   0xd   : > { %p1786_p8 = pneg %p2153_p7  ;;  %p1957_p10 = scmp.ne.s32.totalorder %s2485_s1, %s1956_s16 }
   0xe   : > { %p1963_p0 = scmp.lt.u32.totalorder %s1956_s16, %s2485_s1 }
   0xf   : > { %p2161_p9 = pnand %p2492_p6, %p1786_p8 }
  0x11   : > { %p1958_p11 = pneg %p2161_p9 }
  0x13   : > { %p1959_p12 = pnand %p1958_p11, %p1957_p10 }
  0x15   : > { %p1960_p13 = pneg %p1959_p12 }
  0x17   : > { %p1965_p1 = pnand %p1963_p0, %p1960_p13 }
  0x19   : > { %1968 = shalt.err (!%p1965_p1)
}
  0x1a   : > { %s1969_s21 = scalar_lea.vmem %s214_s12, 1024  ;;  %p1977_p8 = scmp.lt.s32.totalorder %s214_s12, %s214_s12 }
  0x1b   : > { %p1970_p2 = scmp.ne.s32.totalorder %s214_s12, %s1969_s21  ;;  %p1978_p6 = scmp.lt.s32.totalorder %s1969_s21, %s1969_s21 }
  0x1d   : > { %p1972_p3 = pnand %p1970_p2, %p1958_p11  ;;  %p1979_p4 = por %p1978_p6, %p1977_p8 }
  0x1f   : > { %p1973_p5 = pneg %p1972_p3 }
  0x21   : > { %p1980_p7 = pnand %p1979_p4, %p1973_p5 }
  0x23   : > { %1983 = shalt.err (!%p1980_p7)
}
  0x24   : > { %s2077_s22 = smov 256   ;;  %s2078_s23 = smov 16  }
  0x25   : > { %1789 = dma.hbm_to_vmem [thread:$0]  (!%p2161_p9), %s2485_s1, 1024, %s214_s12, [#allocation3], %s2077_s22, %s2077_s22, %s2078_s23  }
  0x26   : > { %p2497_p10 = scmp.ne.s32.totalorder %s2495_s10, 0 }
  0x27   : > { %p2498_p12 = scmp.eq.s32.totalorder (!%p2497_p10), %s2136_s27, 0 }
  0x28   : > { %261 = sbr.rel (%p2497_p10) target bundleno = 979 (0x3d3), region = 48 }
  0x2f   : > { %2029 = dma.done.wait (%p2498_p12), [#allocation3], 1024   ;;  %p2499_p11 = pmov %p2498_p12 }
  0x30   : > { %s2188_s30 = sshll.u32 %s2136_s27, 1  ;;  %v2079_v0 = vmov 0   ;;  %v1887_v1 = vld [vmem:[#allocation2 + $0x4] ss:$16 sps:$4 sm:$0xff]   ;;  %v1889_v2 = vld [vmem:[#allocation2] ss:$16 sps:$4 sm:$0xff]   ;;  %v328_v25 = vlaneseq }
  0x31   : > { %2031 = vsyncadd (%p2499_p11), [#allocation3], 4294966272  ;;  %429 = vmatprep.mubr.bf16.mxu0 %v2079_v0  ;;  %p301_p4 = scmp.lt.s32.totalorder %s2188_s30, 4  ;;  %472 = vmatprep.mubr.bf16.mxu1 %v2079_v0  ;;  %v1890_v3 = vld [vmem:[#allocation2 + $0x24] ss:$16 sps:$4 sm:$0xff]   ;;  %vm393_vm0 = vcmask 261120  }
  0x32   : > { %397 = vmatprep.subr.bf16.mxu0 %v1887_v1  ;;  %v1892_v4 = vld [vmem:[#allocation2 + $0x20] ss:$16 sps:$4 sm:$0xff]   ;;  %v1894_v6 = vld [vmem:[#allocation2 + $0xc] ss:$16 sps:$4 sm:$0xff]   ;;  %v1896_v7 = vld [vmem:[#allocation2 + $0x8] ss:$16 sps:$4 sm:$0xff]  }
  0x33   : > { %s302_s11 = scalar_select %p301_p4, %s2188_s30, 4  ;;  %398 = vmatpush1.bf16.msra.mxu0 %v1889_v2  ;;  %v1897_v8 = vld [vmem:[#allocation2 + $0x2c] ss:$16 sps:$4 sm:$0xff]   ;;  %440 = vmatprep.subr.bf16.mxu1 %v1894_v6  ;;  %v1899_v9 = vld [vmem:[#allocation2 + $0x28] ss:$16 sps:$4 sm:$0xff]   ;;  %v1900_v10 = vld [vmem:[%s2487_s3] sm:$0xff]  }
  0x34   : > { %399 = vmatprep.subr.bf16.mxu0 %v1890_v3  ;;  %441 = vmatpush1.bf16.msra.mxu1 %v1896_v7  ;;  %v2080_v11 = vmov 0.0   ;;  %v1901_v12 = vld [vmem:[%s2487_s3 + $0x8] sm:$0xff]   ;;  %v1902_v13 = vld [vmem:[%s2487_s3 + $0x10] sm:$0xff]   ;;  %v1903_v14 = vld [vmem:[%s2487_s3 + $0x18] sm:$0xff]   ;;  %vm2081_vm1 = vmmov 0   ;;  %v2257_v26 = vshrl.u32 %v328_v25, 7 }
  0x35   : > { %s1446_s12 = sshll.u32 %s302_s11, 2  ;;  %442 = vmatprep.subr.bf16.mxu1 %v1897_v8  ;;  %v1904_v15 = vld [vmem:[%s2487_s3 + $0x20] sm:$0xff]   ;;  %v1905_v16 = vld [vmem:[%s2487_s3 + $0x28] sm:$0xff]   ;;  %v1906_v17 = vld [vmem:[%s2487_s3 + $0x30] sm:$0xff]   ;;  %s2082_s13 = smov 8   ;;  %vm1201_vm2 = vcmask 64512  }
  0x36   : > { %s304_s14 = scalar_lea.vmem %s2484_s0, %s1446_s12  ;;  %v1907_v18 = vld [vmem:[%s2487_s3 + $0x38] sm:$0xff]   ;;  %v1924_v19 = vld [vmem:[%s2489_s5] sm:$0xff]   ;;  %v1925_v20 = vld [vmem:[%s2489_s5 + $0x8] sm:$0xff]   ;;  %v334_v27 = vsub.s32 1, %v2257_v26  ;;  %v338_v29 = vsub.s32 2, %v2257_v26  ;;  %v342_v31 = vsub.s32 3, %v2257_v26 }
  0x37   : > { %v1893_v5 = vld [vmem:[%s304_s14] sm:$0xff]   ;;  %400 = vmatpush1.bf16.msra.mxu0 %v1892_v4  ;;  %v1926_v21 = vld [vmem:[%s2489_s5 + $0x10] sm:$0xff]   ;;  %v1927_v22 = vld [vmem:[%s2489_s5 + $0x18] sm:$0xff]   ;;  %s293_s14 = sand.u32 1, %s2034_s24   ;;  %vm1204_vm3 = vcmask 130048   ;;  %p2500_p6 = scmp.ne.s32.totalorder %s2494_s9, 0 }
  0x38   : > { %1652 = vmatprep.subr.bf16.mxu0 %v2080_v11  ;;  %443 = vmatpush1.bf16.msra.mxu1 %v1899_v9  ;;  %v1928_v23 = vld [vmem:[%s2489_s5 + $0x20] sm:$0xff]   ;;  %v1929_v24 = vld [vmem:[%s2489_s5 + $0x28] sm:$0xff]   ;;  %v1910_v59 = vld [vmem:[%s2487_s3 + $0x50] sm:$0xff]   ;;  %s1444_s15 = sshll.u32 %s293_s14, 4  ;;  %s1215_s24 = ssub.s32 (%p2500_p6), 5, %s2188_s30 }
  0x39   : > { %1672 = vmatprep.subr.bf16.mxu1 %v2080_v11  ;;  %v2263_v28 = vld [vmem:[%s2486_s2] sm:$0xf]  ;;  %v1909_v56 = vld [vmem:[%s2487_s3 + $0x48] sm:$0xff]   ;;  %v1911_v60 = vld [vmem:[%s2487_s3 + $0x58] sm:$0xff]   ;;  %s2438_s16 = scalar_lea.vmem [#allocation4], %s1444_s15   ;;  %s1595_s17 = sshll.u32 (%p2500_p6), %s2136_s27, 4 }
  0x3a   : > { %1456 = vmatmul.mubr.msk.bf16.vlgmr.msra.gmra.mrb[0].mxu0 %vm393_vm0, %v1893_v5  ;;  %v335_v30 = vrot.slane %v2263_v28, %v334_v27  ;;  %v339_v34 = vrot.slane %v2263_v28, %v338_v29  ;;  %v343_v37 = vrot.slane %v2263_v28, %v342_v31  ;;  %v1908_v47 = vld [vmem:[%s2487_s3 + $0x40] sm:$0xff]   ;;  %v1913_v62 = vld [vmem:[%s2487_s3 + $0x68] sm:$0xff]   ;;  %v1914_v63 = vld [vmem:[%s2487_s3 + $0x70] sm:$0xff]   ;;  %p1216_p7 = scmp.lt.s32.totalorder (%p2500_p6), %s1215_s24, 2  ;;  %s2450_s20 = scalar_lea.vmem (%p2500_p6), %s2491_s7, %s1595_s17  }
  0x3b   : > { %1653 = vmatpush3.bf16.msra.mxu0 %v1900_v10  ;;  %1457 = vmatmul.mubr.msk.bf16.vlgmr.msra.gmra.mrb[0].mxu1 %vm393_vm0, %v1893_v5  ;;  %v1912_v61 = vld [vmem:[%s2487_s3 + $0x60] sm:$0xff]   ;;  %v1915_v0 = vld [vmem:[%s2487_s3 + $0x78] sm:$0xff]   ;;  %v1917_v2 = vld [vmem:[%s2487_s3 + $0x88] sm:$0xff]  }
  0x3c   : > { %1654 = vmatprep.subr.bf16.mxu0 %v2080_v11  ;;  %1668 = vmatprep.mubr.msk.bf16.mxu0 %vm2081_vm1, %v2080_v11  ;;  %v1916_v1 = vld [vmem:[%s2487_s3 + $0x80] sm:$0xff]   ;;  %v1918_v3 = vld [vmem:[%s2487_s3 + $0x90] sm:$0xff]   ;;  %v1919_v4 = vld [vmem:[%s2487_s3 + $0x98] sm:$0xff]  }
  0x3d   : > { %1688 = vmatprep.mubr.msk.bf16.mxu1 %vm2081_vm1, %v2080_v11  ;;  %1673 = vmatpush3.bf16.msra.mxu1 %v1924_v19  ;;  %v1920_v5 = vld [vmem:[%s2487_s3 + $0xa0] sm:$0xff]   ;;  %v1921_v6 = vld [vmem:[%s2487_s3 + $0xa8] sm:$0xff]   ;;  %v1922_v7 = vld [vmem:[%s2487_s3 + $0xb0] sm:$0xff]  }
  0x3e   : > { %1674 = vmatprep.subr.bf16.mxu1 %v2080_v11  ;;  %v1923_v8 = vld [vmem:[%s2487_s3 + $0xb8] sm:$0xff]   ;;  %v1930_v9 = vld [vmem:[%s2489_s5 + $0x30] sm:$0xff]   ;;  %v1936_v27 = vld [vmem:[%s2489_s5 + $0x60] sm:$0xff]  }
  0x3f   : > { %1655 = vmatpush3.bf16.msra.mxu0 %v1901_v12  ;;  %v1931_v10 = vld [vmem:[%s2489_s5 + $0x38] sm:$0xff]   ;;  %v1458_v12 = vld [vmem:[%s2488_s4] ss:$0 sm:$0xff]  ;;  %v1937_v29 = vld [vmem:[%s2489_s5 + $0x68] sm:$0xff]  }
  0x40   : > { %1656 = vmatprep.subr.bf16.mxu0 %v2080_v11  ;;  %v1935_v25 = vld [vmem:[%s2489_s5 + $0x58] sm:$0xff]   ;;  %v1938_v31 = vld [vmem:[%s2489_s5 + $0x70] sm:$0xff]  }
  0x41   : > { %1675 = vmatpush3.bf16.msra.mxu1 %v1925_v20 }
  0x42   : > { %1676 = vmatprep.subr.bf16.mxu1 %v2080_v11 }
  0x43   : > { %1657 = vmatpush3.bf16.msra.mxu0 %v1902_v13 }
  0x44   : > { %1658 = vmatprep.subr.bf16.mxu0 %v2080_v11 }
  0x45   : > { %1677 = vmatpush3.bf16.msra.mxu1 %v1926_v21  ;;  %v1932_v21 = vld [vmem:[%s2489_s5 + $0x40] sm:$0xff]  }
  0x46   : > { %1678 = vmatprep.subr.bf16.mxu1 %v2080_v11 }
  0x47   : > { %1659 = vmatpush3.bf16.msra.mxu0 %v1903_v14 }
  0x48   : > { %1660 = vmatprep.subr.bf16.mxu0 %v2080_v11 }
  0x49   : > { %1679 = vmatpush3.bf16.msra.mxu1 %v1927_v22 }
  0x4a   : > { %1680 = vmatprep.subr.bf16.mxu1 %v2080_v11 }
  0x4b   : > { %1661 = vmatpush3.bf16.msra.mxu0 %v1904_v15 }
  0x4c   : > { %1662 = vmatprep.subr.bf16.mxu0 %v2080_v11 }
  0x4d   : > { %1681 = vmatpush3.bf16.msra.mxu1 %v1928_v23  ;;  %v1933_v23 = vld [vmem:[%s2489_s5 + $0x48] sm:$0xff]  }
  0x4e   : > { %1682 = vmatprep.subr.bf16.mxu1 %v2080_v11 }
  0x4f   : > { %1663 = vmatpush3.bf16.msra.mxu0 %v1905_v16 }
  0x50   : > { %1664 = vmatprep.subr.bf16.mxu0 %v2080_v11 }
  0x51   : > { %1683 = vmatpush3.bf16.msra.mxu1 %v1929_v24  ;;  %v1934_v24 = vld [vmem:[%s2489_s5 + $0x50] sm:$0xff]  }
  0x52   : > { %1684 = vmatprep.subr.bf16.mxu1 %v2080_v11 }
  0x53   : > { %1665 = vmatpush3.bf16.msra.mxu0 %v1906_v17 }
  0x54   : > { %1666 = vmatprep.subr.bf16.mxu0 %v2080_v11 }
  0x55   : > { %1685 = vmatpush3.bf16.msra.mxu1 %v1930_v9 }
  0x56   : > { %1686 = vmatprep.subr.bf16.mxu1 %v2080_v11 }
  0x57   : > { %1667 = vmatpush3.bf16.msra.mxu0 %v1907_v18 }
  0x58   : > { %1692 = vmatprep.subr.bf16.mxu0 %v2080_v11 }
  0x59   : > { %1687 = vmatpush3.bf16.msra.mxu1 %v1931_v10 }
  0x5a   : > { %1712 = vmatprep.subr.bf16.mxu1 %v2080_v11 }
 0x10d   : > { %v2268_v32 = vpop.f32.mrb[0].mxu0 }
 0x10e   : > { %v433_v33 = vpop.f32.mrb[1].mxu0  ;;  %v474_v40 = vpop.f32.mrb[0].mxu1 }
 0x10f   : > { %v434_v35 = vadd.f32 %v433_v33, %v335_v30  ;;  %v2271_v36 = vpop.f32.mrb[2].mxu0  ;;  %v475_v41 = vadd.f32 %v474_v40, %v339_v34  ;;  %v476_v42 = vpop.f32.mrb[1].mxu1 }
 0x110   : > { %v437_v38 = vpop.f32.mrb[3].mxu0  ;;  %v477_v45 = vadd.f32 %v476_v42, %v343_v37  ;;  %v478_v46 = vpop.f32.mrb[2].mxu1 }
 0x111   : > { %v438_v39 = vadd.f32 %v437_v38, %v335_v30  ;;  %v484_v43 = vmax.f32 %v434_v35, 0.0  ;;  %v713_v48 = vmax.f32 %v475_v41, 0.0  ;;  %v479_v49 = vadd.f32 %v478_v46, %v339_v34  ;;  %v480_v50 = vpop.f32.mrb[3].mxu1  ;;  %v1493_v30 = vld [vmem:[%s2488_s4 + $0x1] ss:$0 sm:$0xff]  ;;  %v1939_v38 = vld [vmem:[%s2489_s5 + $0x78] sm:$0xff]  }
 0x112   : > { %v941_v52 = vmax.f32 %v477_v45, 0.0  ;;  %v481_v53 = vadd.f32 %v480_v50, %v343_v37  ;;  %v1941_v45 = vld [vmem:[%s2489_s5 + $0x88] sm:$0xff]   ;;  %v1942_v46 = vld [vmem:[%s2489_s5 + $0x90] sm:$0xff]   ;;  %v1543_v50 = vld [vmem:[%s2488_s4 + $0x2] ss:$0 sm:$0xff] }
 0x113   : > { %v485_v44 = vmax.f32 %v438_v39, 0.0  ;;  %v714_v54 = vmax.f32 %v479_v49, 0.0  ;;  %v1945_v49 = vld [vmem:[%s2489_s5 + $0xa8] sm:$0xff]  }
 0x114   : > { %v942_v55 = vmax.f32 %v481_v53, 0.0 }
 0x115   : > { %v486_v51 = vpack.c.bf16 %v485_v44, %v484_v43  ;;  %v715_v57 = vpack.c.bf16 %v714_v54, %v713_v48  ;;  %v1940_v43 = vld [vmem:[%s2489_s5 + $0x80] sm:$0xff]  }
 0x116   : > { %v943_v58 = vpack.c.bf16 %v942_v55, %v941_v52  ;;  %v1944_v48 = vld [vmem:[%s2489_s5 + $0xa0] sm:$0xff]  }
 0x117   : > { %1669 = vmatmul.mubr.bf16.vlgmr.msra.gmra.mrb[4].mxu0 %v486_v51  ;;  %v1946_v51 = vld [vmem:[%s2489_s5 + $0xb0] sm:$0xff]  }
 0x118   : > { %1693 = vmatpush3.bf16.msra.mxu0 %v1908_v47  ;;  %1708 = vmatprep.mubr.msk.bf16.mxu0 %vm2081_vm1, %v2080_v11  ;;  %v1943_v47 = vld [vmem:[%s2489_s5 + $0x98] sm:$0xff]  }
 0x119   : > { %1694 = vmatprep.subr.bf16.mxu0 %v2080_v11 }
 0x11c   : > { %1695 = vmatpush3.bf16.msra.mxu0 %v1909_v56  ;;  %v1947_v56 = vld [vmem:[%s2489_s5 + $0xb8] sm:$0xff]  }
 0x11d   : > { %1696 = vmatprep.subr.bf16.mxu0 %v2080_v11 }
 0x120   : > { %1697 = vmatpush3.bf16.msra.mxu0 %v1910_v59 }
 0x121   : > { %1698 = vmatprep.subr.bf16.mxu0 %v2080_v11 }
 0x124   : > { %1699 = vmatpush3.bf16.msra.mxu0 %v1911_v60 }
 0x125   : > { %1700 = vmatprep.subr.bf16.mxu0 %v2080_v11 }
 0x128   : > { %1701 = vmatpush3.bf16.msra.mxu0 %v1912_v61 }
 0x129   : > { %1702 = vmatprep.subr.bf16.mxu0 %v2080_v11 }
 0x12c   : > { %1703 = vmatpush3.bf16.msra.mxu0 %v1913_v62  ;;  %v1475_v62 = vld [vmem:[%s2490_s6] ss:$0 sm:$0xff] }
 0x12d   : > { %1704 = vmatprep.subr.bf16.mxu0 %v2080_v11 }
 0x130   : > { %1705 = vmatpush3.bf16.msra.mxu0 %v1914_v63 }
 0x131   : > { %1706 = vmatprep.subr.bf16.mxu0 %v2080_v11 }
 0x134   : > { %1707 = vmatpush3.bf16.msra.mxu0 %v1915_v0 }
 0x135   : > { %1732 = vmatprep.subr.bf16.mxu0 %v2080_v11 }
 0x137   : > { %1709 = vmatmul.mubr.bf16.vlgmr.msra.gmra.mrb[8].mxu0 %v715_v57 }
 0x138   : > { %1733 = vmatpush3.bf16.msra.mxu0 %v1916_v1  ;;  %1748 = vmatprep.mubr.msk.bf16.mxu0 %vm2081_vm1, %v2080_v11 }
 0x139   : > { %1734 = vmatprep.subr.bf16.mxu0 %v2080_v11 }
 0x13c   : > { %1735 = vmatpush3.bf16.msra.mxu0 %v1917_v2 }
 0x13d   : > { %1736 = vmatprep.subr.bf16.mxu0 %v2080_v11 }
 0x140   : > { %1737 = vmatpush3.bf16.msra.mxu0 %v1918_v3 }
 0x141   : > { %1738 = vmatprep.subr.bf16.mxu0 %v2080_v11 }
 0x144   : > { %1739 = vmatpush3.bf16.msra.mxu0 %v1919_v4 }
 0x145   : > { %1740 = vmatprep.subr.bf16.mxu0 %v2080_v11 }
 0x148   : > { %1741 = vmatpush3.bf16.msra.mxu0 %v1920_v5 }
 0x149   : > { %1742 = vmatprep.subr.bf16.mxu0 %v2080_v11 }
 0x14c   : > { %1743 = vmatpush3.bf16.msra.mxu0 %v1921_v6 }
 0x14d   : > { %1744 = vmatprep.subr.bf16.mxu0 %v2080_v11 }
 0x150   : > { %1745 = vmatpush3.bf16.msra.mxu0 %v1922_v7 }
 0x151   : > { %1746 = vmatprep.subr.bf16.mxu0 %v2080_v11 }
 0x154   : > { %1747 = vmatpush3.bf16.msra.mxu0 %v1923_v8 }
 0x157   : > { %1749 = vmatmul.mubr.bf16.vlgmr.msra.gmra.mrb[12].mxu0 %v943_v58 }
 0x1ea   : > { %v592_v13 = vpop.f32.mrb[4].mxu0 }
 0x1eb   : > { %v593_v14 = vadd.f32 %v1458_v12, %v592_v13  ;;  %v1670_v15 = vpop.f32.mrb[5].mxu0  ;;  %v1576_v13 = vld [vmem:[%s2490_s6 + $0x1] ss:$0 sm:$0xff] }
 0x1ec   : > { %v595_v16 = vpop.f32.mrb[6].mxu0  ;;  %v1577_v15 = vld [vmem:[%s2490_s6 + $0x2] ss:$0 sm:$0xff] }
 0x1ed   : > { %v596_v17 = vadd.f32 %v1458_v12, %v595_v16  ;;  %v1671_v18 = vpop.f32.mrb[7].mxu0  ;;  %v599_v19 = vmax.f32 %v593_v14, 0.0 }
 0x1ef   : > { %v600_v20 = vmax.f32 %v596_v17, 0.0 }
 0x1f1   : > { %v601_v22 = vpack.c.bf16 %v600_v20, %v599_v19 }
 0x1f3   : > { %1689 = vmatmul.mubr.bf16.vlgmr.msra.gmra.mrb[4].mxu1 %v601_v22 }
 0x1f4   : > { %1713 = vmatpush3.bf16.msra.mxu1 %v1932_v21  ;;  %1728 = vmatprep.mubr.msk.bf16.mxu1 %vm2081_vm1, %v2080_v11  ;;  %v330_v21 = vsub.s32 0, %v2257_v26 }
 0x1f5   : > { %1714 = vmatprep.subr.bf16.mxu1 %v2080_v11 }
 0x1f6   : > { %v331_v22 = vrot.slane %v2263_v28, %v330_v21 }
 0x1f8   : > { %1715 = vmatpush3.bf16.msra.mxu1 %v1933_v23  ;;  %v432_v23 = vadd.f32 %v2268_v32, %v331_v22 }
 0x1f9   : > { %1716 = vmatprep.subr.bf16.mxu1 %v2080_v11 }
 0x1fc   : > { %1717 = vmatpush3.bf16.msra.mxu1 %v1934_v24 }
 0x1fd   : > { %1718 = vmatprep.subr.bf16.mxu1 %v2080_v11 }
 0x200   : > { %1719 = vmatpush3.bf16.msra.mxu1 %v1935_v25 }
 0x201   : > { %1720 = vmatprep.subr.bf16.mxu1 %v2080_v11 }
 0x204   : > { %1721 = vmatpush3.bf16.msra.mxu1 %v1936_v27  ;;  %v436_v27 = vadd.f32 %v2271_v36, %v331_v22 }
 0x205   : > { %1722 = vmatprep.subr.bf16.mxu1 %v2080_v11 }
 0x208   : > { %1723 = vmatpush3.bf16.msra.mxu1 %v1937_v29 }
 0x209   : > { %1724 = vmatprep.subr.bf16.mxu1 %v2080_v11 }
 0x20a   : > { %v823_v33 = vpop.f32.mrb[8].mxu0 }
 0x20b   : > { %v824_v34 = vadd.f32 %v1493_v30, %v823_v33  ;;  %v1710_v35 = vpop.f32.mrb[9].mxu0 }
 0x20c   : > { %v826_v37 = vpop.f32.mrb[10].mxu0  ;;  %1725 = vmatpush3.bf16.msra.mxu1 %v1938_v31 }
 0x20d   : > { %v827_v39 = vadd.f32 %v1493_v30, %v826_v37  ;;  %v1711_v40 = vpop.f32.mrb[11].mxu0  ;;  %1726 = vmatprep.subr.bf16.mxu1 %v2080_v11  ;;  %v830_v41 = vmax.f32 %v824_v34, 0.0 }
 0x20f   : > { %v831_v42 = vmax.f32 %v827_v39, 0.0 }
 0x210   : > { %1727 = vmatpush3.bf16.msra.mxu1 %v1939_v38 }
 0x211   : > { %v832_v44 = vpack.c.bf16 %v831_v42, %v830_v41  ;;  %1752 = vmatprep.subr.bf16.mxu1 %v2080_v11 }
 0x213   : > { %1729 = vmatmul.mubr.bf16.vlgmr.msra.gmra.mrb[4].mxu1 %v832_v44 }
 0x214   : > { %1753 = vmatpush3.bf16.msra.mxu1 %v1940_v43  ;;  %1768 = vmatprep.mubr.msk.bf16.mxu1 %vm2081_vm1, %v2080_v11 }
 0x215   : > { %1754 = vmatprep.subr.bf16.mxu1 %v2080_v11 }
 0x218   : > { %1755 = vmatpush3.bf16.msra.mxu1 %v1941_v45 }
 0x219   : > { %1756 = vmatprep.subr.bf16.mxu1 %v2080_v11 }
 0x21c   : > { %1757 = vmatpush3.bf16.msra.mxu1 %v1942_v46 }
 0x21d   : > { %1758 = vmatprep.subr.bf16.mxu1 %v2080_v11 }
 0x220   : > { %1759 = vmatpush3.bf16.msra.mxu1 %v1943_v47 }
 0x221   : > { %1760 = vmatprep.subr.bf16.mxu1 %v2080_v11 }
 0x224   : > { %1761 = vmatpush3.bf16.msra.mxu1 %v1944_v48 }
 0x225   : > { %1762 = vmatprep.subr.bf16.mxu1 %v2080_v11 }
 0x228   : > { %1763 = vmatpush3.bf16.msra.mxu1 %v1945_v49 }
 0x229   : > { %1764 = vmatprep.subr.bf16.mxu1 %v2080_v11 }
 0x22a   : > { %v1051_v52 = vpop.f32.mrb[12].mxu0 }
 0x22b   : > { %v1052_v53 = vadd.f32 %v1543_v50, %v1051_v52  ;;  %v1750_v54 = vpop.f32.mrb[13].mxu0 }
 0x22c   : > { %v1054_v55 = vpop.f32.mrb[14].mxu0  ;;  %1765 = vmatpush3.bf16.msra.mxu1 %v1946_v51 }
 0x22d   : > { %v1055_v57 = vadd.f32 %v1543_v50, %v1054_v55  ;;  %v1751_v58 = vpop.f32.mrb[15].mxu0  ;;  %1766 = vmatprep.subr.bf16.mxu1 %v2080_v11  ;;  %v1058_v59 = vmax.f32 %v1052_v53, 0.0 }
 0x22f   : > { %v1059_v60 = vmax.f32 %v1055_v57, 0.0 }
 0x230   : > { %1767 = vmatpush3.bf16.msra.mxu1 %v1947_v56 }
 0x231   : > { %v1060_v61 = vpack.c.bf16 %v1059_v60, %v1058_v59 }
 0x233   : > { %1769 = vmatmul.mubr.bf16.vlgmr.msra.gmra.mrb[4].mxu1 %v1060_v61 }
 0x306   : > { %v1160_v63 = vpop.f32.mrb[4].mxu1 }
 0x307   : > { %v1772_v0 = vadd.f32 %v1475_v62, %v1160_v63  ;;  %v1770_v1 = vpop.f32.mrb[5].mxu1 }
 0x308   : > { %v1163_v2 = vpop.f32.mrb[6].mxu1 }
 0x309   : > { %v1169_v3 = vsub.f32 0.0, %v1772_v0  ;;  %v1773_v4 = vadd.f32 %v1475_v62, %v1163_v2  ;;  %v1771_v5 = vpop.f32.mrb[7].mxu1 }
 0x30b   : > { %v1171_v6 = vmul.f32 1.442695, %v1169_v3  ;;  %v1170_v7 = vsub.f32 0.0, %v1773_v4 }
 0x30d   : > { %1948 = vpow2.f32 %v1171_v6  ;;  %v1173_v11 = vmul.f32 1.442695, %v1170_v7 }
 0x30f   : > { %1950 = vpow2.f32 %v1173_v11 }
 0x317   : > { %v1949_v8 = vpop.eup %1948 }
 0x318   : > { %v1175_v9 = vadd.f32 1.0, %v1949_v8 }
 0x319   : > { %v1951_v10 = vpop.eup %1950 }
 0x31a   : > { %1952 = vrcp.f32 %v1175_v9  ;;  %v1176_v12 = vadd.f32 1.0, %v1951_v10 }
 0x31c   : > { %1954 = vrcp.f32 %v1176_v12 }
 0x324   : > { %v1953_v14 = vpop.eup %1952 }
 0x325   : > { %v1184_v16 = vmul.f32 %v1953_v14, %v1576_v13 }
 0x326   : > { %v1955_v17 = vpop.eup %1954 }
 0x327   : > { %v1191_v18 = vadd.f32 %v1577_v15, %v1184_v16  ;;  %v1185_v19 = vmul.f32 %v1955_v17, %v1576_v13 }
 0x329   : > { %1195 = vrot.lane.b32.xlu0 %v1191_v18, %s2082_s13  ;;  %v1192_v20 = vadd.f32 %v1577_v15, %v1185_v19 }
 0x32d   : > { %1197 = vrot.lane.b32.xlu0 %v1192_v20, %s2082_s13 }
 0x39b   : > { %v1196_v24 = vpop.permute.xlu0 %1195  ;;  %1213 = sbr.rel (!%p2500_p6) target bundleno = 979 (0x3d3), region = 56 }
 0x39c   : > { %v1202_v25 = vsel %vm1201_vm2, %v432_v23, %v1196_v24 }
 0x39d   : > { %1205 = vst.msk [vmem:[%s2438_s16] sm:$0xff] %vm1204_vm3, %v1202_v25 }
 0x39f   : > { %v1198_v29 = vpop.permute.xlu0 %1197 }
 0x3a0   : > { %v1203_v30 = vsel %vm1201_vm2, %v436_v27, %v1198_v29 }
 0x3a1   : > { %1206 = vst.msk [vmem:[%s2438_s16 + $0x8] sm:$0xff] %vm1204_vm3, %v1203_v30 }
 0x3a2   : > { %s2505_s24 = smov (!%p1216_p7, %s1215_s24), 2 }
 0x3a3   : > { %s1580_s21 = sshll.u32 %s2505_s24, 7 }
 0x3a4   : > { %p1583_p9 = scmp.eq.s32.totalorder %s1580_s21, 0 }
 0x3a5   : > { %s2456_s22 = sshrl.u32 (!%p1583_p9), %s2505_s24, 1 }
 0x3a6   : > { %1224 = sbr.rel (%p1583_p9) target bundleno = 979 (0x3d3), region = 60  ;;  %p1584_p13 = scmp.le.s32.totalorder (!%p1583_p9), %s2456_s22, 0 }
 0x3ad   : > { %1385 = sbr.rel (%p1584_p13) target bundleno = 958 (0x3be), region = 143  ;;  %s2044_s27 = smov (!%p1584_p13), %s2450_s20  }
 0x3ae   : > { %s2048_s9 = smov (!%p1584_p13), %s2438_s16   ;;  %s2052_s30 = smov (!%p1584_p13), 0  }
 0x3af   : > { %s2056_s23 = smov (!%p1584_p13), 0  }
 0x3b4 LB: >> { %v1288_v26 = vld [vmem:[%s2050_s9] sm:$0xff]  ;;  %v1290_v28 = vld [vmem:[%s2050_s9 + $0x8] sm:$0xff]  ;;  %s1292_s26 = sadd.s32 1, %s2054_s30  ;;  %s1282_s23 = sadd.s32 1, %s2058_s23   ;;  %s2058_s23 = sphi %s2056_s23, %s1282_s23   ;;  %s2054_s30 = sphi %s2052_s30, %s2053_s30   ;;  %s2050_s9 = sphi %s2048_s9, %s1297_s9   ;;  %s2046_s27 = sphi %s2044_s27, %s1298_s27  }
 0x3b5   : >> { %1289 = vst [vmem:[%s2046_s27] sm:$0xff] %v1288_v26  ;;  %1291 = vst [vmem:[%s2046_s27 + $0x8] sm:$0xff] %v1290_v28  ;;  %p1293_p0 = scmp.ge.s32.totalorder %s1292_s26, %s2456_s22  ;;  %p1281_p1 = scmp.ge.s32.totalorder %s1282_s23, %s2456_s22 }
 0x3b7   : >> { %s2507_s26 = smov (%p1293_p0, %s1292_s26), 0  ;;  %1284 = sbr.rel (!%p1281_p1) target bundleno = 948 (0x3b4), region = 149 }
 0x3b8   : >> { %s1585_s29 = sshll.u32 %s2507_s26, 4  ;;  %s2053_s30 = smov %s2507_s26  }
 0x3b9   : >> { %s1297_s9 = scalar_lea.vmem %s2438_s16, %s1585_s29 [#allocation4]   ;;  %s1298_s27 = scalar_lea.vmem %s2450_s20, %s1585_s29  }
 0x3be PF: > { %s2466_s11 = sand.u32 1, %s2505_s24   ;;  %s1596_s12 = sshll.u32 %s2456_s22, 4 }
 0x3bf   : > { %s1303_s10 = scalar_lea.vmem %s2438_s16, %s1596_s12 [#allocation4]   ;;  %s1305_s13 = scalar_lea.vmem %s2450_s20, %s1596_s12  }
 0x3c0   : > { %p1590_p2 = scmp.le.s32.totalorder %s2466_s11, 0 }
 0x3c1   : > { %s2060_s14 = smov (!%p1590_p2), %s1305_s13   ;;  %s2064_s15 = smov (!%p1590_p2), %s1303_s10  }
 0x3c2   : > { %1399 = sbr.rel (%p1590_p2) target bundleno = 979 (0x3d3), region = 154  ;;  %s2068_s17 = smov (!%p1590_p2), 0  }
 0x3c3   : > { %s2072_s18 = smov (!%p1590_p2), 0  }
 0x3c9 LB: >> { %v1315_v32 = vld [vmem:[%s2066_s15] sm:$0xff]  ;;  %s1317_s24 = sadd.s32 1, %s2070_s17  ;;  %s1309_s18 = sadd.s32 1, %s2074_s18   ;;  %s2074_s18 = sphi %s2072_s18, %s1309_s18   ;;  %s2070_s17 = sphi %s2068_s17, %s2069_s17   ;;  %s2066_s15 = sphi %s2064_s15, %s1322_s15   ;;  %s2062_s14 = sphi %s2060_s14, %s1323_s14  }
 0x3ca   : >> { %1316 = vst [vmem:[%s2062_s14] sm:$0xff] %v1315_v32  ;;  %p1318_p3 = scmp.ge.s32.totalorder %s1317_s24, %s2466_s11  ;;  %p1308_p5 = scmp.ge.s32.totalorder %s1309_s18, %s2466_s11 }
 0x3cc   : >> { %s2509_s24 = smov (%p1318_p3, %s1317_s24), 0  ;;  %1311 = sbr.rel (!%p1308_p5) target bundleno = 969 (0x3c9), region = 160 }
 0x3cd   : >> { %s1591_s16 = sshll.u32 %s2509_s24, 3  ;;  %s2069_s17 = smov %s2509_s24  }
 0x3ce   : >> { %s1322_s15 = scalar_lea.vmem %s1303_s10, %s1591_s16 [#allocation4]   ;;  %s1323_s14 = scalar_lea.vmem %s1305_s13, %s1591_s16  }
 0x3d3 PF: > { %p15_p8 = scmp.ge.s32.totalorder %s2138_s28, 5   ;;  %s2501_s24 = smov %s2038_s25 }
 0x3d4   : > { %s2502_s25 = smov %s2146_s8  ;;  %s2503_s26 = smov %s2138_s28 }
 0x3d5   :  { %17 = sbr.rel (!%p15_p8) target bundleno = 2 (0x2), region = 171 }
 0x3dc   :  { %1339 = vsyncpa [#allocation3], 1 }
 0x3dd   :  { %1341 = vsyncpa [#allocation3 + $0x1], 1 }

</bundles_post_ra>
